<compile_context>
chip_gen: v5e
topology: v5e:2x2
jax: 0.10.0
libtpu: 0.0.40
codegen_flags: <defaults>
</compile_context>

<pallas_src>
import math
from functools import partial

import jax
import jax.numpy as jnp
from jax.experimental import pallas as pl
from jax.experimental.pallas import tpu as pltpu


# ---------------------------------------------------------------------------
# static helpers (trace-time Python)
# ---------------------------------------------------------------------------
def _round_up(x: int, m: int) -> int:
    return (x + m - 1) // m * m


def _polyphase_filter(orig_g: int, new_g: int,
                      lowpass_filter_width: int = 6, rolloff: float = 0.99):
    """Windowed-sinc polyphase filter bank, shape (new_g phases, taps), float32.
    # TODO(synk): sox's VHQ 'rate' is a higher-order polyphase design with
    # dithering; this bandlimited-sinc approximation differs beyond float tol.
    """
    base_freq = min(orig_g, new_g) * rolloff
    width = int(math.ceil(lowpass_filter_width * orig_g / base_freq))
    taps = 2 * width + orig_g
    idx = jnp.arange(-width, width + orig_g, dtype=jnp.float32) / orig_g
    phase = -jnp.arange(new_g, dtype=jnp.float32) / new_g
    t = jnp.clip((phase[:, None] + idx[None, :]) * base_freq,
                 -lowpass_filter_width, lowpass_filter_width)
    window = jnp.cos(t * (math.pi / (2.0 * lowpass_filter_width))) ** 2
    h = jnp.sinc(t) * window * (base_freq / orig_g)          # (new_g, taps)
    return h, width, taps


def _choose_group(L: int, M: int, taps: int) -> int:
    """Frames-per-group B: output row width L*B ~ multiple of 128 (lane-dense),
    balancing streamed bytes against the (block-Toeplitz) MXU MACs."""
    tp8 = _round_up(taps, 8)
    best = None
    for B in range(1, 257):
        LB = L * B
        LBp = _round_up(LB, 128)
        if LBp > 2048:
            break
        BM = B * M
        if (BM + tp8) * LBp * 4 > 4 * 1024 * 1024:            # resident filter cap
            continue
        bytes_per = (BM + tp8 + LBp) * 4.0 / LB               # HBM bytes / out sample
        macs_per = (BM + tp8) * LBp / LB                       # MXU MACs / out sample
        score = bytes_per + 0.02 * macs_per
        if best is None or score < best[0]:
            best = (score, B)
    return 1 if best is None else best[1]


def _toeplitz_filters(h, taps, L, B, M, BM, tp8, LBp):
    """H0 (BM, LBp) and halo H1 (tp8, LBp) so that
       out[g*L*B + i*L + p] = sum_j x2d[g, j]*H0[j, i*L+p]
                            + sum_j' next_head[g, j']*H1[j', i*L+p]."""
    col = jnp.arange(LBp)
    i_col = col // L                                           # frame within group
    p_col = col % L                                            # phase
    valid_col = col < L * B

    def band(row0, nrows):
        j = row0 + jnp.arange(nrows)
        k = j[:, None] - (i_col * M)[None, :]
        ok = valid_col[None, :] & (k >= 0) & (k < taps)
        return jnp.where(ok, h[p_col[None, :], jnp.clip(k, 0, taps - 1)],
                         0.0).astype(jnp.float32)

    return band(0, BM), band(BM, tp8)


# ---------------------------------------------------------------------------
# Pallas kernel: grouped polyphase resample + fused masked peak
# ---------------------------------------------------------------------------
def _resample_peak_kernel(x_ref, nh_ref, h0_ref, h1_ref, y_ref, peak_ref,
                          *, LB, n_out, ng):
    j = pl.program_id(0)
    # (NG, BM) @ (BM, LBp) + (NG, tp8) @ (tp8, LBp): MXU, f32 accumulation.
    acc = jnp.dot(x_ref[...], h0_ref[...], preferred_element_type=jnp.float32)
    acc = acc + jnp.dot(nh_ref[...], h1_ref[...],
                        preferred_element_type=jnp.float32)
    y_ref[...] = acc                                           # lane+sublane dense

    # fused peak over *valid* output samples only (free VPU/XLU filler).
    row = jax.lax.broadcasted_iota(jnp.int32, acc.shape, 0)
    col = jax.lax.broadcasted_iota(jnp.int32, acc.shape, 1)
    n_global = (j * ng + row) * LB + col
    valid = (col < LB) & (n_global < n_out)
    tile_max = jnp.max(jnp.where(valid, jnp.abs(acc), 0.0))

    @pl.when(j == 0)
    def _():
        peak_ref[...] = jnp.zeros_like(peak_ref)

    peak_ref[...] = jnp.maximum(peak_ref[...], tile_max)


def _resample_pallas(x2d, next_head, h0, h1, *, NG, LB, LBp, n_out):
    n_rows, BM = x2d.shape
    tp8 = next_head.shape[1]
    kernel = partial(_resample_peak_kernel, LB=LB, n_out=n_out, ng=NG)
    return pl.pallas_call(
        kernel,
        out_shape=(jax.ShapeDtypeStruct((n_rows, LBp), jnp.float32),
                   jax.ShapeDtypeStruct((1, 1), jnp.float32)),
        grid=(pl.cdiv(n_rows, NG),),
        in_specs=[
            pl.BlockSpec((NG, BM), lambda j: (j, 0)),          # streamed signal rows
            pl.BlockSpec((NG, tp8), lambda j: (j, 0)),         # streamed halo rows
            pl.BlockSpec((BM, LBp), lambda j: (0, 0)),         # resident filter
            pl.BlockSpec((tp8, LBp), lambda j: (0, 0)),        # resident halo filter
        ],
        out_specs=(
            pl.BlockSpec((NG, LBp), lambda j: (j, 0)),
            pl.BlockSpec((1, 1), lambda j: (0, 0)),            # resident peak acc
        ),
        # peak accumulates across grid steps -> "arbitrary" (review item 3's
        # accumulator option; trades away v7x core-sharding on this axis).
        compiler_params=pltpu.CompilerParams(
            dimension_semantics=("arbitrary",)),
    )(x2d, next_head, h0, h1)


# ---------------------------------------------------------------------------
# module wrapper
# ---------------------------------------------------------------------------
class SoxEffects:
    """JAX/Pallas port of the torch SoxEffects module:
       effects = [['channels','1'], ['rate', sample_rate], ['norm', norm_db]]."""

    def __init__(self, sample_rate, norm_db, sil_threshold, sil_duration,
                 group_tile=None):
        self.target_rate = int(sample_rate)
        self.norm_db = float(norm_db)
        # stored but unused by the effect chain, matching the torch module.
        self.sil_threshold = sil_threshold
        self.sil_duration = sil_duration
        self.group_tile = group_tile        # optional NG override (tests/tuning)

    def __call__(self, wav, sample_rate):
        wav = jnp.asarray(wav, dtype=jnp.float32)
        if wav.ndim == 1:
            wav = wav[None, :]
        sample_rate = int(sample_rate)
        target_amp = jnp.float32(10.0 ** (self.norm_db / 20.0))

        mono = jnp.mean(wav, axis=0)        # ['channels', '1']
        n_in = int(mono.shape[0])

        # ['rate'] identity: pure fused XLA, no Pallas launch.
        if sample_rate == self.target_rate:
            peak = jnp.max(jnp.abs(mono))
            return (mono * (target_amp / jnp.maximum(peak, 1e-12)))[None, :]

        g = math.gcd(sample_rate, self.target_rate)
        M, L = sample_rate // g, self.target_rate // g
        h, width, taps = _polyphase_filter(M, L)
        n_out = -(-n_in * L // M)           # ceil(n_in * L / M)

        # tiny clips: a single-step pallas_call is pure launch/DMA overhead.
        if n_out < 1024:
            x_ext = jnp.concatenate([jnp.zeros((width,), jnp.float32), mono,
                                     jnp.zeros((taps,), jnp.float32)])
            n = jnp.arange(n_out)
            win = x_ext[(n // L)[:, None] * M + jnp.arange(taps)[None, :]]
            y = jnp.sum(win * h[n % L, :], axis=1)
            peak = jnp.max(jnp.abs(y))
            return (y * (target_amp / jnp.maximum(peak, 1e-12)))[None, :]

        # grouped polyphase: B frames/group -> row g holds L*B consecutive output
        # samples, so the final layout is a plain row-major reshape (no transpose).
        B = _choose_group(L, M, taps)
        LB, LBp = L * B, _round_up(L * B, 128)
        BM, tp8 = B * M, _round_up(taps, 8)
        n_frames = -(-n_out // L)
        n_groups = -(-n_frames // B)
        n_rows = _round_up(n_groups, 8)     # pad rows to sublane multiple only

        # groups-per-tile: as big as comfortably fits the 16 MiB (v5e) scoped VMEM.
        ng_max = int((12 * 1024 * 1024 - 2 * (BM + tp8) * LBp * 4)
                     // (8 * (BM + tp8 + LBp) * 4))
        ng_max = max(8, min(1024, ng_max // 8 * 8))
        NG = min(ng_max, n_rows)
        if self.group_tile is not None:
            NG = max(8, min(NG, _round_up(int(self.group_tile), 8)))

        # padded 1-D signal: x2d is a pure reshape (no taps-times im2col);
        # next_head duplicates only the tp8-sample halo of each group row.
        total = n_rows * BM + tp8
        x_pad = jnp.concatenate([
            jnp.zeros((width,), jnp.float32), mono,
            jnp.zeros((max(0, total - width - n_in),), jnp.float32)])[:total]
        x2d = x_pad[:n_rows * BM].reshape(n_rows, BM)
        head_idx = ((jnp.arange(n_rows) + 1) * BM)[:, None] + \
            jnp.arange(tp8)[None, :]
        next_head = x_pad[head_idx]

        h0, h1 = _toeplitz_filters(h, taps, L, B, M, BM, tp8, LBp)

        y2d, peak = _resample_pallas(x2d, next_head, h0, h1,
                                     NG=NG, LB=LB, LBp=LBp, n_out=n_out)

        # ['norm']: scale folded into the final fused XLA reshape (no extra pass).
        scale = target_amp / jnp.maximum(peak[0, 0], 1e-12)
        y = y2d[:, :LB] if LBp != LB else y2d
        return (y.reshape(-1)[:n_out] * scale)[None, :]


if __name__ == "__main__":
    key = jax.random.PRNGKey(0)
    # stereo waveform: 2 channels x 8192 samples @ 16 kHz -> mono 8 kHz, norm -3 dB
    n_in, src_rate = 8192, 16000
    wav = 0.5 * jax.random.normal(key, (2, n_in), dtype=jnp.float32)

    effects = SoxEffects(sample_rate=8000, norm_db=-3.0,
                         sil_threshold=1.0, sil_duration=0.1)
    out = jax.block_until_ready(effects(wav, sample_rate=src_rate))

    # also exercise a multi-step grid (group_tile=8 -> 4 grid steps).
    effects_multi = SoxEffects(sample_rate=8000, norm_db=-3.0,
                               sil_threshold=1.0, sil_duration=0.1, group_tile=8)
    out_multi = jax.block_until_ready(effects_multi(wav, sample_rate=src_rate))

    n_out = (n_in * 1 + 2 - 1) // 2         # ceil(n_in * L / M) with L=1, M=2
    target = 10.0 ** (-3.0 / 20.0)
    assert out.shape == (1, n_out) and out.dtype == jnp.float32
    assert out_multi.shape == (1, n_out)
    # 'norm' semantics: peak amplitude must hit the -3 dB target (self-consistent).
    assert abs(float(jnp.max(jnp.abs(out))) - target) < 1e-3
    assert abs(float(jnp.max(jnp.abs(out_multi))) - target) < 1e-3

    # independent float32 reference of the same effect chain (per output sample).
    mono = jnp.mean(wav, axis=0)
    M, L = 2, 1
    h, width, taps = _polyphase_filter(M, L)
    x_ext = jnp.concatenate([jnp.zeros((width,), jnp.float32), mono,
                             jnp.zeros((taps,), jnp.float32)])
    n = jnp.arange(n_out)
    win = x_ext[(n // L)[:, None] * M + jnp.arange(taps)[None, :]]
    y_ref = jnp.sum(win * h[n % L, :], axis=1)
    y_ref = y_ref * (target / jnp.maximum(jnp.max(jnp.abs(y_ref)), 1e-12))
    err = float(jnp.max(jnp.abs(out[0] - y_ref)))
    err_multi = float(jnp.max(jnp.abs(out_multi[0] - y_ref)))
    # tolerance covers possible reduced-precision MXU passes for the f32 matmul.
    assert err < 5e-2 and err_multi < 5e-2, (err, err_multi)

    print("KERNEL_OK")
</pallas_src>

<mosaic_0001>
module attributes {stable_mosaic.version = 11 : i64} {
  func.func @_resample_peak_kernel(%arg0: i32, %arg1: memref<32x256xf32, #tpu.memory_space<vmem>>, %arg2: memref<32x32xf32, #tpu.memory_space<vmem>>, %arg3: memref<256x128xf32, #tpu.memory_space<vmem>>, %arg4: memref<32x128xf32, #tpu.memory_space<vmem>>, %arg5: memref<32x128xf32, #tpu.memory_space<vmem>>, %arg6: memref<1x1xf32, #tpu.memory_space<vmem>>) attributes {dimension_semantics = [#tpu.dimension_semantics<arbitrary>], iteration_bounds = array<i64: 1>, scalar_prefetch = 0 : i64, scratch_operands = 0 : i64, tpu.core_type = #tpu.core_type<tc>, window_params = [{transform_indices = @transform_0, window_bounds = array<i64: 32, 256>}, {transform_indices = @transform_1, window_bounds = array<i64: 32, 32>}, {pipeline_mode = #tpu.pipeline_mode<synchronous>, transform_indices = @transform_2, window_bounds = array<i64: 256, 128>}, {pipeline_mode = #tpu.pipeline_mode<synchronous>, transform_indices = @transform_3, window_bounds = array<i64: 32, 128>}, {transform_indices = @transform_4, window_bounds = array<i64: 32, 128>}, {pipeline_mode = #tpu.pipeline_mode<synchronous>, transform_indices = @transform_5, window_bounds = array<i64: 1, 1>}]} {
    %c0 = arith.constant 0 : index
    %c0_0 = arith.constant 0 : index
    %0 = vector.load %arg1[%c0, %c0_0] : memref<32x256xf32, #tpu.memory_space<vmem>>, vector<32x256xf32>
    %c0_1 = arith.constant 0 : index
    %c0_2 = arith.constant 0 : index
    %1 = vector.load %arg3[%c0_1, %c0_2] : memref<256x128xf32, #tpu.memory_space<vmem>>, vector<256x128xf32>
    %cst = arith.constant dense<0.000000e+00> : vector<32x128xf32>
    %2 = tpu.matmul %0, %1, %cst {dimension_numbers = #tpu.dot_dimension_numbers<[1], [0], [0], [1], [0, 0, 1, 1], [], []>} : vector<32x256xf32>, vector<256x128xf32>, vector<32x128xf32> -> vector<32x128xf32>
    %c0_3 = arith.constant 0 : index
    %c0_4 = arith.constant 0 : index
    %3 = vector.load %arg2[%c0_3, %c0_4] : memref<32x32xf32, #tpu.memory_space<vmem>>, vector<32x32xf32>
    %c0_5 = arith.constant 0 : index
    %c0_6 = arith.constant 0 : index
    %4 = vector.load %arg4[%c0_5, %c0_6] : memref<32x128xf32, #tpu.memory_space<vmem>>, vector<32x128xf32>
    %cst_7 = arith.constant dense<0.000000e+00> : vector<32x128xf32>
    %5 = tpu.matmul %3, %4, %cst_7 {dimension_numbers = #tpu.dot_dimension_numbers<[1], [0], [0], [1], [0, 0, 1, 1], [], []>} : vector<32x32xf32>, vector<32x128xf32>, vector<32x128xf32> -> vector<32x128xf32>
    %6 = arith.addf %2, %5 : vector<32x128xf32>
    %c0_8 = arith.constant 0 : index
    %c0_9 = arith.constant 0 : index
    %7 = vector.load %arg5[%c0_8, %c0_9] : memref<32x128xf32, #tpu.memory_space<vmem>>, vector<32x128xf32>
    tpu.vector_store %arg5[%c0_8, %c0_9], %6 {strides = array<i32>} : memref<32x128xf32, #tpu.memory_space<vmem>>, vector<32x128xf32>,
    %8 = tpu.iota {dimensions = array<i32: 0>} : vector<32x128xi32>
    %9 = tpu.iota {dimensions = array<i32: 1>} : vector<32x128xi32>
    %c32_i32 = arith.constant 32 : i32
    %10 = arith.muli %arg0, %c32_i32 : i32
    %11 = vector.broadcast %10 : i32 to vector<32x128xi32>
    %12 = arith.addi %11, %8 : vector<32x128xi32>
    %c128_i32 = arith.constant 128 : i32
    %13 = vector.broadcast %c128_i32 : i32 to vector<32x128xi32>
    %14 = arith.muli %12, %13 : vector<32x128xi32>
    %15 = arith.addi %14, %9 : vector<32x128xi32>
    %c128_i32_10 = arith.constant 128 : i32
    %16 = vector.broadcast %c128_i32_10 : i32 to vector<32x128xi32>
    %17 = arith.cmpi slt, %9, %16 : vector<32x128xi32>
    %c4096_i32 = arith.constant 4096 : i32
    %18 = vector.broadcast %c4096_i32 : i32 to vector<32x128xi32>
    %19 = arith.cmpi slt, %15, %18 : vector<32x128xi32>
    %20 = arith.andi %17, %19 : vector<32x128xi1>
    %21 = math.absf %6 : vector<32x128xf32>
    %cst_11 = arith.constant 0.000000e+00 : f32
    %22 = vector.broadcast %cst_11 : f32 to vector<32x128xf32>
    %23 = arith.select %20, %21, %22 : vector<32x128xi1>, vector<32x128xf32>
    %24 = vector.shape_cast %23 : vector<32x128xf32> to vector<1x32x128xf32>
    %cst_12 = arith.constant dense<0xFF800000> : vector<1xf32>
    %25 = vector.multi_reduction <maximumf>, %24, %cst_12 [1, 2] : vector<1x32x128xf32> to vector<1xf32>
    %26 = vector.shape_cast %25 : vector<1xf32> to vector<1x1x1xf32>
    %27 = vector.extract %26[0, 0, 0] : f32 from vector<1x1x1xf32>
    %c0_i32 = arith.constant 0 : i32
    %28 = arith.cmpi eq, %arg0, %c0_i32 : i32
    %29 = arith.extui %28 : i1 to i32
    %c0_i32_13 = arith.constant 0 : i32
    %30 = arith.cmpi ne, %29, %c0_i32_13 : i32
    scf.if %30 {
      %cst_18 = arith.constant 0.000000e+00 : f32
      %35 = vector.broadcast %cst_18 : f32 to vector<1x1xf32>
      %c0_19 = arith.constant 0 : index
      %c0_20 = arith.constant 0 : index
      %36 = vector.load %arg6[%c0_19, %c0_20] : memref<1x1xf32, #tpu.memory_space<vmem>>, vector<1x1xf32>
      tpu.vector_store %arg6[%c0_19, %c0_20], %35 {strides = array<i32>} : memref<1x1xf32, #tpu.memory_space<vmem>>, vector<1x1xf32>,
    } else {
    }
    %c0_14 = arith.constant 0 : index
    %c0_15 = arith.constant 0 : index
    %31 = vector.load %arg6[%c0_14, %c0_15] : memref<1x1xf32, #tpu.memory_space<vmem>>, vector<1x1xf32>
    %32 = vector.broadcast %27 : f32 to vector<1x1xf32>
    %33 = arith.maximumf %31, %32 : vector<1x1xf32>
    %c0_16 = arith.constant 0 : index
    %c0_17 = arith.constant 0 : index
    %34 = vector.load %arg6[%c0_16, %c0_17] : memref<1x1xf32, #tpu.memory_space<vmem>>, vector<1x1xf32>
    tpu.vector_store %arg6[%c0_16, %c0_17], %33 {strides = array<i32>} : memref<1x1xf32, #tpu.memory_space<vmem>>, vector<1x1xf32>,
    return
  }
  func.func @transform_0(%arg0: i32) -> (i32, i32) {
    %c0_i32 = arith.constant 0 : i32
    %c0_i32_0 = arith.constant 0 : i32
    return %arg0, %c0_i32 : i32, i32
  }
  func.func @transform_1(%arg0: i32) -> (i32, i32) {
    %c0_i32 = arith.constant 0 : i32
    %c0_i32_0 = arith.constant 0 : i32
    return %arg0, %c0_i32 : i32, i32
  }
  func.func @transform_2(%arg0: i32) -> (i32, i32) {
    %c0_i32 = arith.constant 0 : i32
    %c0_i32_0 = arith.constant 0 : i32
    %c0_i32_1 = arith.constant 0 : i32
    return %c0_i32, %c0_i32_0 : i32, i32
  }
  func.func @transform_3(%arg0: i32) -> (i32, i32) {
    %c0_i32 = arith.constant 0 : i32
    %c0_i32_0 = arith.constant 0 : i32
    %c0_i32_1 = arith.constant 0 : i32
    return %c0_i32, %c0_i32_0 : i32, i32
  }
  func.func @transform_4(%arg0: i32) -> (i32, i32) {
    %c0_i32 = arith.constant 0 : i32
    %c0_i32_0 = arith.constant 0 : i32
    return %arg0, %c0_i32 : i32, i32
  }
  func.func @transform_5(%arg0: i32) -> (i32, i32) {
    %c0_i32 = arith.constant 0 : i32
    %c0_i32_0 = arith.constant 0 : i32
    %c0_i32_1 = arith.constant 0 : i32
    return %c0_i32, %c0_i32_0 : i32, i32
  }
}

</mosaic_0001>

<bundles_post_ra>
// kernel: tpu_custom_call.1
= control target key start
LH: loop header
LB: loop body
LE: loop exit
PB: predicated region body
PF: predicated region fallthrough
CT: control target
= control target key end

     0   :  { %11 = vsyncpa [#allocation3], 0  ;;  %s612_s0 = inlined_call_operand.hbm [shape: f32[32,256], index: 0, kind: input, shape index: {}]   ;;  %s613_s1 = inlined_call_operand.hbm [shape: f32[32,32], index: 1, kind: input, shape index: {}]   ;;  %s614_s2 = inlined_call_operand.hbm [shape: f32[256,128], index: 2, kind: input, shape index: {}]   ;;  %s615_s3 = inlined_call_operand.hbm [shape: f32[32,128], index: 3, kind: input, shape index: {}]   ;;  %s616_s4 = inlined_call_operand.hbm [shape: f32[32,128], index: 4, kind: output, shape index: {0}]   ;;  %s617_s5 = inlined_call_operand.hbm [shape: f32[1,1], index: 5, kind: output, shape index: {1}]  }
   0x1   :  { %12 = vsyncpa [#allocation6], 0 }
   0x2   :  { %13 = vsyncpa [#allocation9], 0 }
   0x3   :  { %14 = vsyncpa [#allocation4], 0  ;;  %s33_s20 = sshll.u32 %s613_s1, 4  ;;  %s34_s20 = int_to_ptr.hbm [resolvable:$true] %s33_s20 }
   0x4   :  { %15 = vsyncpa [#allocation12], 0  ;;  %s537_s21 = smov [#allocation5]   ;;  %s20_s25 = sshll.u32 %s612_s0, 4  ;;  %s21_s25 = int_to_ptr.hbm [resolvable:$true] %s20_s25 }
   0x5   :  { %s35_s22 = sshll.u32 %s537_s21, 4  ;;  %s538_s26 = smov 128   ;;  %s36_s22 = int_to_ptr.vmem [resolvable:$true] %s35_s22 }
   0x6   :  { %s539_s27 = smov 8   ;;  %s540_s28 = smov [#allocation2]  }
   0x7   :  { %41 = dma.hbm_to_vmem [thread:$0]  %s34_s20, 512, %s36_s22, [#allocation6], %s538_s26, %s538_s26, %s539_s27  }
   0x8   :  { %s22_s29 = sshll.u32 %s540_s28, 4  ;;  %s541_s1 = smov 256   ;;  %s23_s29 = int_to_ptr.vmem [resolvable:$true] %s22_s29 }
   0x9   :  { %s542_s30 = smov 16   ;;  %s46_s8 = sshll.u32 %s614_s2, 4  ;;  %s47_s8 = int_to_ptr.hbm [resolvable:$true] %s46_s8 }
   0xa   :  { %28 = dma.hbm_to_vmem [thread:$0]  %s21_s25, 1024, %s23_s29, [#allocation3], %s541_s1, %s541_s1, %s542_s30  }
   0xb   :  { %s543_s9 = smov [#allocation7]   ;;  %s59_s12 = sshll.u32 %s615_s3, 4  ;;  %s60_s12 = int_to_ptr.hbm [resolvable:$true] %s59_s12 }
   0xc   :  { %s48_s0 = sshll.u32 %s543_s9, 4  ;;  %s544_s13 = smov [#allocation8]   ;;  %s49_s0 = int_to_ptr.vmem [resolvable:$true] %s48_s0 }
   0xd   :  { %54 = dma.hbm_to_vmem [thread:$0]  %s47_s8, 4096, %s49_s0, [#allocation6], %s538_s26, %s538_s26, %s539_s27  }
   0xe   :  { %s61_s14 = sshll.u32 %s544_s13, 4  ;;  %s62_s14 = int_to_ptr.vmem [resolvable:$true] %s61_s14 }
   0xf   :  { %67 = dma.hbm_to_vmem [thread:$0]  %s60_s12, 512, %s62_s14, [#allocation9], %s538_s26, %s538_s26, %s539_s27  }
  0x10   :  { %527 = dma.done.wait [#allocation3], 1024  }
  0x11   :  { %528 = vsyncadd [#allocation3], 4294966272 }
  0x12   :  { %529 = dma.done.wait [#allocation6], 4608  }
  0x13   :  { %530 = vsyncadd [#allocation6], 4294962688 }
  0x14   :  { %531 = dma.done.wait [#allocation9], 512  }
  0x15   :  { %532 = vsyncadd [#allocation9], 4294966784  ;;  %v131_v0 = vld [vmem:[#allocation8 + $0x18] sm:$0xff]  ;;  %v130_v2 = vld [vmem:[#allocation8 + $0x10] sm:$0xff]  ;;  %vm132_vm0 = vcmask 261120   ;;  %v236_v53 = vlaneseq  ;;  %s545_s2 = smov [#allocation10]  }
  0x16   :  { %v107_v1 = vld [vmem:[#allocation7 + $0x78] sm:$0xff]  ;;  %157 = vmatpush.msra.mxu0 %v131_v0  ;;  %v106_v3 = vld [vmem:[#allocation7 + $0x70] sm:$0xff]  ;;  %v129_v5 = vld [vmem:[#allocation8 + $0x8] sm:$0xff]  ;;  %s301_s3 = sshll.u32 %s545_s2, 4  ;;  %s303_s17 = sshll.u32 %s616_s4, 4  ;;  %vm290_vm5 = vcmask 0   ;;  %s302_s3 = int_to_ptr.vmem [resolvable:$true] %s301_s3  ;;  %s304_s17 = int_to_ptr.hbm [resolvable:$true] %s303_s17 }
  0x17   :  { %174 = vmatpush.msra.mxu1 %v107_v1  ;;  %v123_v4 = vld [vmem:[#allocation7 + $0xf8] sm:$0xff]  ;;  %338 = vmatpush.msra.mxu3 %v107_v1  ;;  %v105_v6 = vld [vmem:[#allocation7 + $0x68] sm:$0xff]  ;;  %v122_v7 = vld [vmem:[#allocation7 + $0xf0] sm:$0xff]  ;;  %v237_v60 = vshrl.u32 %v236_v53, 7  ;;  %s547_s18 = smov [#allocation11]   ;;  %s317_s21 = sshll.u32 %s617_s5, 4  ;;  %s318_s21 = int_to_ptr.hbm [resolvable:$true] %s317_s21 }
  0x18   :  { %354 = vmatpush.msra.mxu2 %v123_v4  ;;  %158 = vmatpush.msra.mxu0 %v130_v2  ;;  %v121_v8 = vld [vmem:[#allocation7 + $0xe8] sm:$0xff]  ;;  %v128_v9 = vld [vmem:[#allocation8] sm:$0xff]  ;;  %v103_v12 = vld [vmem:[#allocation7 + $0x58] sm:$0xff]  ;;  %s315_s4 = sshll.u32 %s547_s18, 4  ;;  %s316_s4 = int_to_ptr.vmem [resolvable:$true] %s315_s4 }
  0x19   :  { %175 = vmatpush.msra.mxu1 %v106_v3  ;;  %339 = vmatpush.msra.mxu3 %v106_v3  ;;  %v104_v10 = vld [vmem:[#allocation7 + $0x60] sm:$0xff]  ;;  %v102_v14 = vld [vmem:[#allocation7 + $0x50] sm:$0xff]  ;;  %v119_v15 = vld [vmem:[#allocation7 + $0xd8] sm:$0xff]  ;;  %v238_v62 = vadd.s32 8, %v237_v60  ;;  %v239_v0 = vadd.s32 16, %v237_v60  ;;  %v240_v1 = vadd.s32 24, %v237_v60 }
  0x1a   :  { %355 = vmatpush.msra.mxu2 %v122_v7  ;;  %159 = vmatpush.msra.mxu0 %v129_v5  ;;  %v124_v11 = vld [vmem:[#allocation5] sm:$0xff]  ;;  %v101_v16 = vld [vmem:[#allocation7 + $0x48] sm:$0xff]  ;;  %v118_v17 = vld [vmem:[#allocation7 + $0xd0] sm:$0xff]  ;;  %v249_v5 = vmul.u32 128, %v237_v60 }
  0x1b   :  { %176 = vmatpush.msra.mxu1 %v105_v6  ;;  %340 = vmatpush.msra.mxu3 %v105_v6  ;;  %v120_v13 = vld [vmem:[#allocation7 + $0xe0] sm:$0xff]  ;;  %v117_v19 = vld [vmem:[#allocation7 + $0xc8] sm:$0xff]  ;;  %v99_v21 = vld [vmem:[#allocation7 + $0x38] sm:$0xff]  ;;  %v250_v6 = vmul.u32 128, %v238_v62 }
  0x1c   :  { %356 = vmatpush.msra.mxu2 %v121_v8  ;;  %160 = vmatpush.msra.mxu0 %v128_v9  ;;  %v100_v18 = vld [vmem:[#allocation7 + $0x40] sm:$0xff]  ;;  %v125_v20 = vld [vmem:[#allocation5 + $0x8] sm:$0xff]  ;;  %v98_v23 = vld [vmem:[#allocation7 + $0x30] sm:$0xff]  ;;  %v252_v9 = vmul.u32 128, %v240_v1 }
  0x1d   :  { %177 = vmatpush.msra.mxu1 %v104_v10  ;;  %341 = vmatpush.msra.mxu3 %v104_v10  ;;  %v116_v22 = vld [vmem:[#allocation7 + $0xc0] sm:$0xff]  ;;  %v115_v24 = vld [vmem:[#allocation7 + $0xb8] sm:$0xff]  ;;  %v97_v25 = vld [vmem:[#allocation7 + $0x28] sm:$0xff] }
  0x1e   :  { %334 = vmatmul.msk.f32.vlgmr.msra.gmra.mxu0 %vm132_vm0, %v124_v11  ;;  %357 = vmatpush.msra.mxu2 %v120_v13  ;;  %v114_v26 = vld [vmem:[#allocation7 + $0xb0] sm:$0xff]  ;;  %v96_v27 = vld [vmem:[#allocation7 + $0x20] sm:$0xff]  ;;  %v113_v28 = vld [vmem:[#allocation7 + $0xa8] sm:$0xff] }
  0x1f   :  { %178 = vmatpush.msra.mxu1 %v103_v12  ;;  %203 = vmatpush.msrb.mxu0 %v123_v4  ;;  %v126_v29 = vld [vmem:[#allocation5 + $0x10] sm:$0xff]  ;;  %v95_v30 = vld [vmem:[#allocation7 + $0x18] sm:$0xff]  ;;  %v112_v31 = vld [vmem:[#allocation7 + $0xa0] sm:$0xff]  ;;  %v242_v4 = vand.u32 127, %v236_v53 }
  0x20   :  { %342 = vmatpush.msra.mxu3 %v103_v12  ;;  %358 = vmatpush.msra.mxu2 %v119_v15  ;;  %v94_v32 = vld [vmem:[#allocation7 + $0x10] sm:$0xff]  ;;  %v111_v33 = vld [vmem:[#allocation7 + $0x98] sm:$0xff]  ;;  %v93_v34 = vld [vmem:[#allocation7 + $0x8] sm:$0xff] }
  0x21   :  { %179 = vmatpush.msra.mxu1 %v102_v14  ;;  %204 = vmatpush.msrb.mxu0 %v122_v7  ;;  %v110_v35 = vld [vmem:[#allocation7 + $0x90] sm:$0xff]  ;;  %v92_v36 = vld [vmem:[#allocation7] sm:$0xff]  ;;  %v109_v37 = vld [vmem:[#allocation7 + $0x88] sm:$0xff]  ;;  %v253_v10 = vadd.s32 %v249_v5, %v242_v4  ;;  %v254_v11 = vadd.s32 %v250_v6, %v242_v4 }
  0x22   :  { %343 = vmatpush.msra.mxu3 %v102_v14  ;;  %359 = vmatpush.msra.mxu2 %v118_v17  ;;  %v127_v38 = vld [vmem:[#allocation5 + $0x18] sm:$0xff]  ;;  %v84_v39 = vld [vmem:[#allocation2] sm:$0xff]  ;;  %v86_v40 = vld [vmem:[#allocation2 + $0x10] sm:$0xff]  ;;  %v256_v14 = vadd.s32 %v252_v9, %v242_v4 }
  0x23   :  { %180 = vmatpush.msra.mxu1 %v101_v16  ;;  %205 = vmatpush.msrb.mxu0 %v121_v8  ;;  %v108_v41 = vld [vmem:[#allocation7 + $0x80] sm:$0xff]  ;;  %v87_v42 = vld [vmem:[#allocation2 + $0x18] sm:$0xff]  ;;  %v85_v43 = vld [vmem:[#allocation2 + $0x8] sm:$0xff]  ;;  %v251_v8 = vmul.u32 128, %v239_v0  ;;  %vm258_vm1 = vcmp.lt.s32.totalorder %v253_v10, 4096  ;;  %vm259_vm2 = vcmp.lt.s32.totalorder %v254_v11, 4096 }
  0x24   :  { %344 = vmatpush.msra.mxu3 %v101_v16  ;;  %360 = vmatpush.msra.mxu2 %v117_v19  ;;  %v88_v44 = vld [vmem:[#allocation2 + $0x20] sm:$0xff]  ;;  %v89_v45 = vld [vmem:[#allocation2 + $0x28] sm:$0xff]  ;;  %v90_v46 = vld [vmem:[#allocation2 + $0x30] sm:$0xff]  ;;  %vm261_vm4 = vcmp.lt.s32.totalorder %v256_v14, 4096 }
  0x25   :  { %181 = vmatpush.msra.mxu1 %v100_v18  ;;  %206 = vmatpush.msrb.mxu0 %v120_v13  ;;  %v91_v47 = vld [vmem:[#allocation2 + $0x38] sm:$0xff]  ;;  %v255_v13 = vadd.s32 %v251_v8, %v242_v4 }
  0x26   :  { %345 = vmatpush.msra.mxu3 %v100_v18  ;;  %335 = vmatmul.msk.f32.gmra.mxu0 %vm132_vm0, %v125_v20 }
  0x27   :  { %182 = vmatpush.msra.mxu1 %v99_v21  ;;  %207 = vmatpush.msrb.mxu0 %v119_v15  ;;  %vm260_vm3 = vcmp.lt.s32.totalorder %v255_v13, 4096 }
  0x28   :  { %346 = vmatpush.msra.mxu3 %v99_v21  ;;  %361 = vmatpush.msra.mxu2 %v116_v22 }
  0x29   :  { %183 = vmatpush.msra.mxu1 %v98_v23  ;;  %208 = vmatpush.msrb.mxu0 %v118_v17 }
  0x2a   :  { %347 = vmatpush.msra.mxu3 %v98_v23  ;;  %362 = vmatpush.msra.mxu2 %v115_v24 }
  0x2b   :  { %184 = vmatpush.msra.mxu1 %v97_v25  ;;  %209 = vmatpush.msrb.mxu0 %v117_v19 }
  0x2c   :  { %348 = vmatpush.msra.mxu3 %v97_v25  ;;  %363 = vmatpush.msra.mxu2 %v114_v26 }
  0x2d   :  { %185 = vmatpush.msra.mxu1 %v96_v27  ;;  %210 = vmatpush.msrb.mxu0 %v116_v22 }
  0x2e   :  { %349 = vmatpush.msra.mxu3 %v96_v27  ;;  %364 = vmatpush.msra.mxu2 %v113_v28 }
  0x2f   :  { %336 = vmatmul.msk.f32.gmra.mxu0 %vm132_vm0, %v126_v29  ;;  %186 = vmatpush.msra.mxu1 %v95_v30 }
  0x30   :  { %350 = vmatpush.msra.mxu3 %v95_v30  ;;  %211 = vmatpush.msrb.mxu0 %v115_v24 }
  0x31   :  { %365 = vmatpush.msra.mxu2 %v112_v31  ;;  %187 = vmatpush.msra.mxu1 %v94_v32 }
  0x32   :  { %351 = vmatpush.msra.mxu3 %v94_v32  ;;  %212 = vmatpush.msrb.mxu0 %v114_v26 }
  0x33   :  { %366 = vmatpush.msra.mxu2 %v111_v33  ;;  %188 = vmatpush.msra.mxu1 %v93_v34 }
  0x34   :  { %352 = vmatpush.msra.mxu3 %v93_v34  ;;  %213 = vmatpush.msrb.mxu0 %v113_v28 }
  0x35   :  { %367 = vmatpush.msra.mxu2 %v110_v35  ;;  %189 = vmatpush.msra.mxu1 %v92_v36 }
  0x36   :  { %353 = vmatpush.msra.mxu3 %v92_v36  ;;  %214 = vmatpush.msrb.mxu0 %v112_v31  ;;  %v546_v36 = vmov 0.0  }
  0x37   :  { %368 = vmatpush.msra.mxu2 %v109_v37  ;;  %337 = vmatmul.msk.f32.gmra.mxu0 %vm132_vm0, %v127_v38  ;;  %291 = vst.msk [vmem:[#allocation11] sm:$0x1] %vm290_vm5, %v546_v36 }
  0x38   :  { %190 = vmatmul.f32.vlgmr.msra.gmra.mxu1 %v84_v39  ;;  %193 = vmatmul.f32.vlgmr.msra.gmra.mxu3 %v86_v40 }
  0x39   :  { %215 = vmatpush.msrb.mxu0 %v111_v33  ;;  %369 = vmatpush.msra.mxu2 %v108_v41 }
  0x3a   :  { %222 = vmatmul.f32.vlgmr.msra.gmra.mxu2 %v87_v42 }
  0x3b   :  { %216 = vmatpush.msrb.mxu0 %v110_v35 }
  0x3d   :  { %217 = vmatpush.msrb.mxu0 %v109_v37 }
  0x3e   :  { %v292_v37 = vld [vmem:[#allocation11] sm:$0x1] }
  0x3f   :  { %218 = vmatpush.msrb.mxu0 %v108_v41 }
  0x40   :  { %219 = vmatmul.f32.vlgmr.msrb.gmra.mxu0 %v85_v43  ;;  %196 = vmatmul.f32.gmra.mxu3 %v88_v44 }
  0x42   :  { %225 = vmatmul.f32.gmra.mxu2 %v89_v45 }
  0x48   :  { %199 = vmatmul.f32.gmra.mxu3 %v90_v46 }
  0x4a   :  { %228 = vmatmul.f32.gmra.mxu2 %v91_v47 }
  0x9b   :  { %v162_v48 = vpop.f32.mrf.mxu0 }
  0xa3   :  { %v165_v49 = vpop.f32.mrf.mxu0 }
  0xac   :  { %v168_v50 = vpop.f32.mrf.mxu0 }
  0xb4   :  { %v171_v51 = vpop.f32.mrf.mxu0 }
  0xb5   :  { %v191_v52 = vpop.f32.mrf.mxu1 }
  0xb6   :  { %v192_v54 = vadd.f32 %v191_v52, %v162_v48 }
  0xbb   :  { %v194_v55 = vpop.f32.mrf.mxu3 }
  0xbc   :  { %v195_v56 = vadd.f32 %v194_v55, %v165_v49 }
  0xbd   :  { %v220_v57 = vpop.f32.mrf.mxu0  ;;  %v223_v59 = vpop.f32.mrf.mxu2 }
  0xbe   :  { %v221_v58 = vadd.f32 %v220_v57, %v192_v54  ;;  %v224_v61 = vadd.f32 %v223_v59, %v195_v56 }
  0xc0   :  { %232 = vst [vmem:[#allocation10] sm:$0xff] %v221_v58  ;;  %v266_v15 = vand.u32 2147483647, %v221_v58  ;;  %v267_v16 = vand.u32 2147483647, %v224_v61 }
  0xc1   :  { %233 = vst [vmem:[#allocation10 + $0x8] sm:$0xff] %v224_v61 }
  0xc2   :  { %v270_v22 = vsel %vm258_vm1, %v266_v15, 0.0  ;;  %v271_v23 = vsel %vm259_vm2, %v267_v16, 0.0 }
  0xc3   :  { %v197_v63 = vpop.f32.mrf.mxu3  ;;  %v274_v26 = vmax.f32 %v270_v22, %v271_v23 }
  0xc4   :  { %v198_v2 = vadd.f32 %v197_v63, %v168_v50 }
  0xc5   :  { %v226_v3 = vpop.f32.mrf.mxu2 }
  0xc6   :  { %v227_v7 = vadd.f32 %v226_v3, %v198_v2 }
  0xc8   :  { %234 = vst [vmem:[#allocation10 + $0x10] sm:$0xff] %v227_v7  ;;  %v268_v19 = vand.u32 2147483647, %v227_v7 }
  0xca   :  { %v272_v24 = vsel %vm260_vm3, %v268_v19, 0.0 }
  0xcb   :  { %v200_v12 = vpop.f32.mrf.mxu3 }
  0xcc   :  { %v201_v17 = vadd.f32 %v200_v12, %v171_v51 }
  0xcd   :  { %v229_v18 = vpop.f32.mrf.mxu2 }
  0xce   :  { %v230_v20 = vadd.f32 %v229_v18, %v201_v17 }
  0xd0   :  { %235 = vst [vmem:[#allocation10 + $0x18] sm:$0xff] %v230_v20  ;;  %v269_v21 = vand.u32 2147483647, %v230_v20 }
  0xd1   :  { %309 = dma.vmem_to_hbm [thread:$0]  %s302_s3, 512, %s304_s17, [#allocation4], %s538_s26, %s538_s26, %s539_s27  }
  0xd2   :  { %v273_v25 = vsel %vm261_vm4, %v269_v21, 0.0 }
  0xd3   :  { %v275_v27 = vmax.f32 %v272_v24, %v273_v25 }
  0xd5   :  { %v276_v28 = vmax.f32 %v274_v26, %v275_v27 }
  0xd7   :  { %277 = vmax.xlane.f32.xlu0 %v276_v28 }
 0x14a   :  { %v278_v29 = vpop.xlane.xlu0 %277 }
 0x14b   :  { %v279_v30 = vrot.slane %v278_v29, 4 }
 0x14d   :  { %v280_v31 = vmax.f32 %v278_v29, %v279_v30 }
 0x14f   :  { %v281_v32 = vrot.slane %v280_v31, 2 }
 0x151   :  { %v282_v33 = vmax.f32 %v280_v31, %v281_v32 }
 0x153   :  { %v283_v34 = vrot.slane %v282_v33, 1 }
 0x155   :  { %v284_v35 = vmax.f32 %v282_v33, %v283_v34 }
 0x157   :  { %370 = vpush %v284_v35 }
 0x188   :  { %s371_s22 = spop %370 }
 0x189   :  { %v293_v38 = vstv %s371_s22 }
 0x18a   :  { %v294_v39 = vmax.f32 %v292_v37, %v293_v38 }
 0x18c   :  { %296 = vst.msk [vmem:[#allocation11] sm:$0x1] %vm290_vm5, %v294_v39 }
 0x18d   :  { %320 = dma.vmem_to_hbm [thread:$0]  %s316_s4, 16, %s318_s21, [#allocation12]  }
 0x18e   :  { %533 = dma.done.wait [#allocation4], 512  }
 0x18f   :  { %534 = vsyncadd [#allocation4], 4294966784 }
 0x190   :  { %535 = dma.done.wait [#allocation12], 16  }
 0x191   :  { %536 = vsyncadd [#allocation12], 4294967280 }
 0x192   :  { %329 = vsyncpa [#allocation3], 1 }
 0x193   :  { %330 = vsyncpa [#allocation6], 1 }
 0x194   :  { %331 = vsyncpa [#allocation9], 1 }
 0x195   :  { %332 = vsyncpa [#allocation4], 1 }
 0x196   :  { %333 = vsyncpa [#allocation12], 1 }

</bundles_post_ra>
